<compile_context>
chip_gen: v5e
topology: v5e:2x2
jax: 0.10.0
libtpu: 0.0.40
codegen_flags: <defaults>
</compile_context>

<pallas_src>
import functools

import jax
import jax.numpy as jnp
from jax.experimental import pallas as pl
from jax.experimental.pallas import tpu as pltpu

IN_FEATURES = 28 * 28   # 784
HIDDEN = 256
NUM_CLASSES = 10
PAD_N = 128             # lane-dense padded output width
MIN_TB = 16             # bf16 sublane-packed row tile


def _round_up(x, m):
    return ((x + m - 1) // m) * m


def _mlp_softmax_kernel(x_ref, w1_ref, b1_ref, w2_ref, b2_ref, o_ref):
    # x_ref:  (TB, 784) bf16        w1_ref: (784, 256) bf16   b1_ref: (1, 256) f32
    # w2_ref: (256, 128) bf16 (cols >= 10 are zero-padded)
    # b2_ref: (1, 128) f32 (cols >= 10 are -1e30 -> softmax mask baked in)
    # o_ref:  (TB, 128) bf16 (softmax probs; cols >= 10 come out exactly 0)

    # Linear(784 -> 256) + ReLU.  bf16 MXU feed, f32 accumulation.
    h = jnp.dot(x_ref[...], w1_ref[...],
                preferred_element_type=jnp.float32) + b1_ref[...]
    h = jnp.maximum(h, 0.0)

    # Linear(256 -> 10), computed lane-dense at width 128.  Padded lanes get
    # logits == -1e30 straight from the bias (their w2 columns are zero).
    logits = jnp.dot(h.astype(jnp.bfloat16), w2_ref[...],
                     preferred_element_type=jnp.float32) + b2_ref[...]

    # Numerically stable softmax over dim=1 (exact divide: kernel is DMA-bound,
    # so the divide is free and keeps parity with torch.softmax).
    m = jnp.max(logits, axis=-1, keepdims=True)
    e = jnp.exp(logits - m)
    denom = jnp.sum(e, axis=-1, keepdims=True)
    o_ref[...] = (e / denom).astype(o_ref.dtype)


@functools.partial(jax.jit, static_argnames=("tb",))
def feed_forward_net(x_nchw, w1, b1, w2, b2, *, tb=1024):
    """Forward pass matching FeedForwardNet.forward.

    x_nchw: (B, 1, 28, 28) float (NCHW, like PyTorch)
    w1: (784, 256), b1: (1, 256), w2: (256, 10), b2: (1, 10)
    returns: (B, 10) float32 softmax probabilities.
    """
    B = x_nchw.shape[0]

    # nn.Flatten(): keep batch dim, flatten rest row-major (== torch).  Ship
    # activations in bf16 — x dominates HBM traffic; the cast fuses with this
    # flatten/pad producer (no-op if the caller already supplies bf16).
    x_flat = x_nchw.reshape(B, -1).astype(jnp.bfloat16)

    # Batch tile: default 1024, but capped so the grid has >= 4 steps when the
    # batch allows it — on v7x megacore each TensorCore then gets >= 2
    # pipelined steps.  Floor at the 16-row bf16 sublane tile.
    TB = max(MIN_TB, min(tb, _round_up(pl.cdiv(B, 4), MIN_TB)))
    B_pad = _round_up(B, TB)
    if B_pad != B:
        x_flat = jnp.pad(x_flat, ((0, B_pad - B), (0, 0)))

    # Weights in bf16 (native MXU dtype, halves resident weight footprint);
    # biases stay f32.
    w1_bf16 = w1.astype(jnp.bfloat16)
    b1_f32 = b1.reshape(1, HIDDEN).astype(jnp.float32)
    # Second layer zero-padded to a lane-dense 128-wide output; the padded-class
    # softmax mask is baked into the bias (-1e30) so the kernel needs no iota/where.
    w2_pad = jnp.pad(w2, ((0, 0), (0, PAD_N - NUM_CLASSES))).astype(jnp.bfloat16)
    b2_pad = jnp.pad(b2.reshape(1, NUM_CLASSES).astype(jnp.float32),
                     ((0, 0), (0, PAD_N - NUM_CLASSES)),
                     constant_values=-1e30)

    grid = (B_pad // TB,)

    out = pl.pallas_call(
        _mlp_softmax_kernel,
        out_shape=jax.ShapeDtypeStruct((B_pad, PAD_N), jnp.bfloat16),
        grid_spec=pltpu.PrefetchScalarGridSpec(
            num_scalar_prefetch=0,
            grid=grid,
            in_specs=[
                # x: tiled along batch, double-buffered DMA.
                pl.BlockSpec((TB, IN_FEATURES), lambda i: (i, 0)),
                # Weights/biases: constant block index every step -> DMA'd once,
                # VMEM-resident for the whole grid (no re-DMA).  Total VMEM at
                # TB=1024 is ~5-6 MiB, well under the scoped default on
                # v5e/v6e/v7x, so no vmem_limit_bytes override is required.
                pl.BlockSpec((IN_FEATURES, HIDDEN), lambda i: (0, 0)),
                pl.BlockSpec((1, HIDDEN), lambda i: (0, 0)),
                pl.BlockSpec((HIDDEN, PAD_N), lambda i: (0, 0)),
                pl.BlockSpec((1, PAD_N), lambda i: (0, 0)),
            ],
            out_specs=pl.BlockSpec((TB, PAD_N), lambda i: (i, 0)),
        ),
        compiler_params=pltpu.CompilerParams(
            dimension_semantics=("parallel",),  # megacore batch sharding (v7x)
        ),
    )(x_flat, w1_bf16, b1_f32, w2_pad, b2_pad)

    # Drop batch padding and the zero-padded class lanes; return f32 like torch.
    return out[:B, :NUM_CLASSES].astype(jnp.float32)


def init_params(key):
    """Deterministic init mimicking nn.Linear default (U[-1/sqrt(fan_in), +1/sqrt(fan_in)])."""
    k1, k2, k3, k4 = jax.random.split(key, 4)
    fan1 = IN_FEATURES
    fan2 = HIDDEN
    lim1 = 1.0 / jnp.sqrt(jnp.float32(fan1))
    lim2 = 1.0 / jnp.sqrt(jnp.float32(fan2))
    # stored as (in, out) so kernel does x @ W
    w1 = jax.random.uniform(k1, (fan1, HIDDEN), jnp.float32, -lim1, lim1)
    b1 = jax.random.uniform(k2, (1, HIDDEN), jnp.float32, -lim1, lim1)
    w2 = jax.random.uniform(k3, (fan2, NUM_CLASSES), jnp.float32, -lim2, lim2)
    b2 = jax.random.uniform(k4, (1, NUM_CLASSES), jnp.float32, -lim2, lim2)
    return w1, b1, w2, b2


def _reference(x_nchw, w1, b1, w2, b2):
    """Pure-JAX reference with the same bf16 activation/weight quantization."""
    B = x_nchw.shape[0]
    x = x_nchw.reshape(B, -1).astype(jnp.bfloat16).astype(jnp.float32)
    h = x @ w1.astype(jnp.bfloat16).astype(jnp.float32) + b1.reshape(1, -1)
    h = jnp.maximum(h, 0.0).astype(jnp.bfloat16).astype(jnp.float32)
    logits = h @ w2.astype(jnp.bfloat16).astype(jnp.float32) + b2.reshape(1, -1)
    return jax.nn.softmax(logits, axis=1)


if __name__ == "__main__":
    key = jax.random.PRNGKey(0)
    k_x, k_p = jax.random.split(key)

    B = 2
    x = jax.random.normal(k_x, (B, 1, 28, 28), jnp.float32)  # NCHW like PyTorch
    w1, b1, w2, b2 = init_params(k_p)

    probs = feed_forward_net(x, w1, b1, w2, b2)
    probs = jax.block_until_ready(probs)

    assert probs.shape == (B, NUM_CLASSES)

    # softmax rows sum to 1 (bf16 output storage -> slightly loose tolerance)
    row_sums = jnp.sum(probs, axis=1)
    assert jnp.allclose(row_sums, jnp.ones((B,), jnp.float32), atol=1e-2)

    # match the pure-JAX reference (same bf16 quantization of x / h / weights)
    ref = _reference(x, w1, b1, w2, b2)
    assert jnp.allclose(probs, ref, atol=2e-2), float(jnp.max(jnp.abs(probs - ref)))

    print("KERNEL_OK")
</pallas_src>

<mosaic_0001>
module attributes {stable_mosaic.version = 11 : i64} {
  func.func @_mlp_softmax_kernel(%arg0: i32, %arg1: memref<16x784xbf16, #tpu.memory_space<vmem>>, %arg2: memref<784x256xbf16, #tpu.memory_space<vmem>>, %arg3: memref<1x256xf32, #tpu.memory_space<vmem>>, %arg4: memref<256x128xbf16, #tpu.memory_space<vmem>>, %arg5: memref<1x128xf32, #tpu.memory_space<vmem>>, %arg6: memref<16x128xbf16, #tpu.memory_space<vmem>>) attributes {dimension_semantics = [#tpu.dimension_semantics<parallel>], iteration_bounds = array<i64: 1>, scalar_prefetch = 0 : i64, scratch_operands = 0 : i64, tpu.core_type = #tpu.core_type<tc>, window_params = [{transform_indices = @transform_0, window_bounds = array<i64: 16, 784>}, {pipeline_mode = #tpu.pipeline_mode<synchronous>, transform_indices = @transform_1, window_bounds = array<i64: 784, 256>}, {pipeline_mode = #tpu.pipeline_mode<synchronous>, transform_indices = @transform_2, window_bounds = array<i64: 1, 256>}, {pipeline_mode = #tpu.pipeline_mode<synchronous>, transform_indices = @transform_3, window_bounds = array<i64: 256, 128>}, {pipeline_mode = #tpu.pipeline_mode<synchronous>, transform_indices = @transform_4, window_bounds = array<i64: 1, 128>}, {transform_indices = @transform_5, window_bounds = array<i64: 16, 128>}]} {
    %c0 = arith.constant 0 : index
    %c0_0 = arith.constant 0 : index
    %0 = vector.load %arg1[%c0, %c0_0] : memref<16x784xbf16, #tpu.memory_space<vmem>>, vector<16x784xbf16>
    %c0_1 = arith.constant 0 : index
    %c0_2 = arith.constant 0 : index
    %1 = vector.load %arg2[%c0_1, %c0_2] : memref<784x256xbf16, #tpu.memory_space<vmem>>, vector<784x256xbf16>
    %cst = arith.constant dense<0.000000e+00> : vector<16x256xf32>
    %2 = tpu.matmul %0, %1, %cst {dimension_numbers = #tpu.dot_dimension_numbers<[1], [0], [0], [1], [0, 0, 1, 1], [], []>} : vector<16x784xbf16>, vector<784x256xbf16>, vector<16x256xf32> -> vector<16x256xf32>
    %c0_3 = arith.constant 0 : index
    %c0_4 = arith.constant 0 : index
    %3 = vector.load %arg3[%c0_3, %c0_4] : memref<1x256xf32, #tpu.memory_space<vmem>>, vector<1x256xf32>
    %4 = vector.broadcast %3 : vector<1x256xf32> to vector<16x256xf32>
    %5 = arith.addf %2, %4 : vector<16x256xf32>
    %cst_5 = arith.constant 0.000000e+00 : f32
    %6 = vector.broadcast %cst_5 : f32 to vector<16x256xf32>
    %7 = arith.maximumf %5, %6 : vector<16x256xf32>
    %8 = arith.truncf %7 : vector<16x256xf32> to vector<16x256xbf16>
    %c0_6 = arith.constant 0 : index
    %c0_7 = arith.constant 0 : index
    %9 = vector.load %arg4[%c0_6, %c0_7] : memref<256x128xbf16, #tpu.memory_space<vmem>>, vector<256x128xbf16>
    %cst_8 = arith.constant dense<0.000000e+00> : vector<16x128xf32>
    %10 = tpu.matmul %8, %9, %cst_8 {dimension_numbers = #tpu.dot_dimension_numbers<[1], [0], [0], [1], [0, 0, 1, 1], [], []>} : vector<16x256xbf16>, vector<256x128xbf16>, vector<16x128xf32> -> vector<16x128xf32>
    %c0_9 = arith.constant 0 : index
    %c0_10 = arith.constant 0 : index
    %11 = vector.load %arg5[%c0_9, %c0_10] : memref<1x128xf32, #tpu.memory_space<vmem>>, vector<1x128xf32>
    %12 = vector.broadcast %11 : vector<1x128xf32> to vector<16x128xf32>
    %13 = arith.addf %10, %12 : vector<16x128xf32>
    %cst_11 = arith.constant dense<0xFF800000> : vector<16xf32>
    %14 = vector.multi_reduction <maximumf>, %13, %cst_11 [1] : vector<16x128xf32> to vector<16xf32>
    %15 = vector.shape_cast %14 : vector<16xf32> to vector<16x1xf32>
    %16 = vector.broadcast %15 : vector<16x1xf32> to vector<16x128xf32>
    %17 = arith.subf %13, %16 : vector<16x128xf32>
    %18 = math.exp %17 : vector<16x128xf32>
    %cst_12 = arith.constant dense<0.000000e+00> : vector<16xf32>
    %19 = vector.multi_reduction <add>, %18, %cst_12 [1] : vector<16x128xf32> to vector<16xf32>
    %20 = vector.shape_cast %19 : vector<16xf32> to vector<16x1xf32>
    %21 = vector.broadcast %20 : vector<16x1xf32> to vector<16x128xf32>
    %22 = arith.divf %18, %21 : vector<16x128xf32>
    %23 = arith.truncf %22 : vector<16x128xf32> to vector<16x128xbf16>
    %c0_13 = arith.constant 0 : index
    %c0_14 = arith.constant 0 : index
    %24 = vector.load %arg6[%c0_13, %c0_14] : memref<16x128xbf16, #tpu.memory_space<vmem>>, vector<16x128xbf16>
    tpu.vector_store %arg6[%c0_13, %c0_14], %23 {strides = array<i32>} : memref<16x128xbf16, #tpu.memory_space<vmem>>, vector<16x128xbf16>,
    return
  }
  func.func @transform_0(%arg0: i32) -> (i32, i32) {
    %c0_i32 = arith.constant 0 : i32
    %c0_i32_0 = arith.constant 0 : i32
    return %arg0, %c0_i32 : i32, i32
  }
  func.func @transform_1(%arg0: i32) -> (i32, i32) {
    %c0_i32 = arith.constant 0 : i32
    %c0_i32_0 = arith.constant 0 : i32
    %c0_i32_1 = arith.constant 0 : i32
    return %c0_i32, %c0_i32_0 : i32, i32
  }
  func.func @transform_2(%arg0: i32) -> (i32, i32) {
    %c0_i32 = arith.constant 0 : i32
    %c0_i32_0 = arith.constant 0 : i32
    %c0_i32_1 = arith.constant 0 : i32
    return %c0_i32, %c0_i32_0 : i32, i32
  }
  func.func @transform_3(%arg0: i32) -> (i32, i32) {
    %c0_i32 = arith.constant 0 : i32
    %c0_i32_0 = arith.constant 0 : i32
    %c0_i32_1 = arith.constant 0 : i32
    return %c0_i32, %c0_i32_0 : i32, i32
  }
  func.func @transform_4(%arg0: i32) -> (i32, i32) {
    %c0_i32 = arith.constant 0 : i32
    %c0_i32_0 = arith.constant 0 : i32
    %c0_i32_1 = arith.constant 0 : i32
    return %c0_i32, %c0_i32_0 : i32, i32
  }
  func.func @transform_5(%arg0: i32) -> (i32, i32) {
    %c0_i32 = arith.constant 0 : i32
    %c0_i32_0 = arith.constant 0 : i32
    return %arg0, %c0_i32 : i32, i32
  }
}

</mosaic_0001>

<bundles_post_ra>
// kernel: feed_forward_net.1
= control target key start
LH: loop header
LB: loop body
LE: loop exit
PB: predicated region body
PF: predicated region fallthrough
CT: control target
= control target key end

     0   :  { %vm658_vm0 = vcmask 130048   ;;  %s2444_s1 = inlined_call_operand.vmem [shape: bf16[784,256], index: 1, kind: input, shape index: {}]   ;;  %s2445_s0 = inlined_call_operand.vmem [shape: bf16[16,784], index: 0, kind: input, shape index: {}]   ;;  %s2446_s4 = inlined_call_operand.vmem [shape: f32[1,128], index: 4, kind: input, shape index: {}]   ;;  %s2447_s3 = inlined_call_operand.vmem [shape: bf16[256,128], index: 3, kind: input, shape index: {}]   ;;  %s2448_s2 = inlined_call_operand.vmem [shape: f32[1,256], index: 2, kind: input, shape index: {}]   ;;  %s2449_s5 = inlined_call_operand.vmem [shape: bf16[16,128], index: 5, kind: output, shape index: {}]  }
   0x1   :  { %v1162_v0 = vld [vmem:[%s2444_s1 + $0x70] sm:$0xf]  ;;  %v1584_v1 = vld [vmem:[%s2444_s1 + $0x74] sm:$0xf0]  ;;  %v1154_v11 = vld [vmem:[%s2444_s1 + $0x60] sm:$0xf] }
   0x2   :  { %v1290_v2 = vld [vmem:[%s2444_s1 + $0x170] sm:$0xf]  ;;  %v1163_v3 = vor.u32 %v1584_v1, %v1162_v0  ;;  %v1616_v4 = vld [vmem:[%s2444_s1 + $0x174] sm:$0xf0]  ;;  %v1582_v13 = vld [vmem:[%s2444_s1 + $0x64] sm:$0xf0] }
   0x3   :  { %v1354_v5 = vld [vmem:[%s2444_s1 + $0x1f0] sm:$0xf]  ;;  %v1632_v6 = vld [vmem:[%s2444_s1 + $0x1f4] sm:$0xf0]  ;;  %v1291_v7 = vor.u32 %v1616_v4, %v1290_v2  ;;  %v1282_v14 = vld [vmem:[%s2444_s1 + $0x160] sm:$0xf]  ;;  %v1155_v16 = vor.u32 %v1582_v13, %v1154_v11 }
   0x4   :  { %v1355_v8 = vor.u32 %v1632_v6, %v1354_v5  ;;  %v1226_v9 = vld [vmem:[%s2444_s1 + $0xf0] sm:$0xf]  ;;  %v1600_v10 = vld [vmem:[%s2444_s1 + $0xf4] sm:$0xf0]  ;;  %662 = vmatpush.bf16.msra.mxu0 %v1163_v3  ;;  %v1614_v15 = vld [vmem:[%s2444_s1 + $0x164] sm:$0xf0] }
   0x5   :  { %v1227_v12 = vor.u32 %v1600_v10, %v1226_v9  ;;  %690 = vmatpush.bf16.msra.mxu2 %v1291_v7  ;;  %v1283_v17 = vor.u32 %v1614_v15, %v1282_v14  ;;  %v1346_v18 = vld [vmem:[%s2444_s1 + $0x1e0] sm:$0xf]  ;;  %v1630_v19 = vld [vmem:[%s2444_s1 + $0x1e4] sm:$0xf0]  ;;  %v1146_v23 = vld [vmem:[%s2444_s1 + $0x50] sm:$0xf] }
   0x6   :  { %704 = vmatpush.bf16.msra.mxu3 %v1355_v8  ;;  %v1218_v20 = vld [vmem:[%s2444_s1 + $0xe0] sm:$0xf]  ;;  %v1347_v21 = vor.u32 %v1630_v19, %v1346_v18  ;;  %v1598_v22 = vld [vmem:[%s2444_s1 + $0xe4] sm:$0xf0]  ;;  %v1580_v24 = vld [vmem:[%s2444_s1 + $0x54] sm:$0xf0] }
   0x7   :  { %676 = vmatpush.bf16.msra.mxu1 %v1227_v12  ;;  %v1219_v25 = vor.u32 %v1598_v22, %v1218_v20  ;;  %v1274_v26 = vld [vmem:[%s2444_s1 + $0x150] sm:$0xf]  ;;  %v1612_v27 = vld [vmem:[%s2444_s1 + $0x154] sm:$0xf0]  ;;  %v1147_v29 = vor.u32 %v1580_v24, %v1146_v23  ;;  %v1138_v35 = vld [vmem:[%s2444_s1 + $0x40] sm:$0xf] }
   0x8   :  { %v1338_v28 = vld [vmem:[%s2444_s1 + $0x1d0] sm:$0xf]  ;;  %663 = vmatpush.bf16.msra.mxu0 %v1155_v16  ;;  %v1628_v30 = vld [vmem:[%s2444_s1 + $0x1d4] sm:$0xf0]  ;;  %v1275_v33 = vor.u32 %v1612_v27, %v1274_v26  ;;  %v1578_v36 = vld [vmem:[%s2444_s1 + $0x44] sm:$0xf0] }
   0x9   :  { %v1210_v31 = vld [vmem:[%s2444_s1 + $0xd0] sm:$0xf]  ;;  %v1596_v32 = vld [vmem:[%s2444_s1 + $0xd4] sm:$0xf0]  ;;  %691 = vmatpush.bf16.msra.mxu2 %v1283_v17  ;;  %v1339_v34 = vor.u32 %v1628_v30, %v1338_v28  ;;  %v1266_v37 = vld [vmem:[%s2444_s1 + $0x140] sm:$0xf]  ;;  %v1139_v44 = vor.u32 %v1578_v36, %v1138_v35 }
   0xa   :  { %705 = vmatpush.bf16.msra.mxu3 %v1347_v21  ;;  %v1211_v38 = vor.u32 %v1596_v32, %v1210_v31  ;;  %v1610_v39 = vld [vmem:[%s2444_s1 + $0x144] sm:$0xf0]  ;;  %v1330_v40 = vld [vmem:[%s2444_s1 + $0x1c0] sm:$0xf]  ;;  %v1130_v47 = vld [vmem:[%s2444_s1 + $0x30] sm:$0xf] }
   0xb   :  { %677 = vmatpush.bf16.msra.mxu1 %v1219_v25  ;;  %v1626_v41 = vld [vmem:[%s2444_s1 + $0x1c4] sm:$0xf0]  ;;  %v1202_v42 = vld [vmem:[%s2444_s1 + $0xc0] sm:$0xf]  ;;  %v1267_v45 = vor.u32 %v1610_v39, %v1266_v37  ;;  %v1576_v48 = vld [vmem:[%s2444_s1 + $0x34] sm:$0xf0] }
   0xc   :  { %v1594_v43 = vld [vmem:[%s2444_s1 + $0xc4] sm:$0xf0]  ;;  %664 = vmatpush.bf16.msra.mxu0 %v1147_v29  ;;  %v1331_v46 = vor.u32 %v1626_v41, %v1330_v40  ;;  %v1258_v49 = vld [vmem:[%s2444_s1 + $0x130] sm:$0xf]  ;;  %v1608_v51 = vld [vmem:[%s2444_s1 + $0x134] sm:$0xf0]  ;;  %v1131_v56 = vor.u32 %v1576_v48, %v1130_v47 }
   0xd   :  { %692 = vmatpush.bf16.msra.mxu2 %v1275_v33  ;;  %v1203_v50 = vor.u32 %v1594_v43, %v1202_v42  ;;  %v1322_v52 = vld [vmem:[%s2444_s1 + $0x1b0] sm:$0xf]  ;;  %v1624_v53 = vld [vmem:[%s2444_s1 + $0x1b4] sm:$0xf0]  ;;  %v1259_v57 = vor.u32 %v1608_v51, %v1258_v49  ;;  %v1122_v59 = vld [vmem:[%s2444_s1 + $0x20] sm:$0xf] }
   0xe   :  { %706 = vmatpush.bf16.msra.mxu3 %v1339_v34  ;;  %v1194_v54 = vld [vmem:[%s2444_s1 + $0xb0] sm:$0xf]  ;;  %v1592_v55 = vld [vmem:[%s2444_s1 + $0xb4] sm:$0xf0]  ;;  %v1323_v58 = vor.u32 %v1624_v53, %v1322_v52  ;;  %v1574_v60 = vld [vmem:[%s2444_s1 + $0x24] sm:$0xf0] }
   0xf   :  { %678 = vmatpush.bf16.msra.mxu1 %v1211_v38  ;;  %v1250_v61 = vld [vmem:[%s2444_s1 + $0x120] sm:$0xf]  ;;  %v1195_v62 = vor.u32 %v1592_v55, %v1194_v54  ;;  %v1606_v63 = vld [vmem:[%s2444_s1 + $0x124] sm:$0xf0]  ;;  %v1123_v4 = vor.u32 %v1574_v60, %v1122_v59  ;;  %v1114_v5 = vld [vmem:[%s2444_s1 + $0x10] sm:$0xf] }
  0x10   :  { %665 = vmatpush.bf16.msra.mxu0 %v1139_v44  ;;  %v1314_v0 = vld [vmem:[%s2444_s1 + $0x1a0] sm:$0xf]  ;;  %v1622_v1 = vld [vmem:[%s2444_s1 + $0x1a4] sm:$0xf0]  ;;  %v1251_v6 = vor.u32 %v1606_v63, %v1250_v61  ;;  %v1572_v8 = vld [vmem:[%s2444_s1 + $0x14] sm:$0xf0] }
  0x11   :  { %693 = vmatpush.bf16.msra.mxu2 %v1267_v45  ;;  %v1186_v2 = vld [vmem:[%s2444_s1 + $0xa0] sm:$0xf]  ;;  %v1590_v3 = vld [vmem:[%s2444_s1 + $0xa4] sm:$0xf0]  ;;  %v1315_v7 = vor.u32 %v1622_v1, %v1314_v0  ;;  %v1242_v9 = vld [vmem:[%s2444_s1 + $0x110] sm:$0xf]  ;;  %v1115_v18 = vor.u32 %v1572_v8, %v1114_v5 }
  0x12   :  { %707 = vmatpush.bf16.msra.mxu3 %v1331_v46  ;;  %v1604_v10 = vld [vmem:[%s2444_s1 + $0x114] sm:$0xf0]  ;;  %v1187_v11 = vor.u32 %v1590_v3, %v1186_v2  ;;  %v1306_v12 = vld [vmem:[%s2444_s1 + $0x190] sm:$0xf]  ;;  %v1106_v16 = vld [vmem:[%s2444_s1] sm:$0xf] }
  0x13   :  { %679 = vmatpush.bf16.msra.mxu1 %v1203_v50  ;;  %v1620_v13 = vld [vmem:[%s2444_s1 + $0x194] sm:$0xf0]  ;;  %v1178_v14 = vld [vmem:[%s2444_s1 + $0x90] sm:$0xf]  ;;  %v1570_v17 = vld [vmem:[%s2444_s1 + $0x4] sm:$0xf0]  ;;  %v1243_v23 = vor.u32 %v1604_v10, %v1242_v9 }
  0x14   :  { %666 = vmatpush.bf16.msra.mxu0 %v1131_v56  ;;  %v1588_v15 = vld [vmem:[%s2444_s1 + $0x94] sm:$0xf0]  ;;  %v1234_v19 = vld [vmem:[%s2444_s1 + $0x100] sm:$0xf]  ;;  %v1602_v20 = vld [vmem:[%s2444_s1 + $0x104] sm:$0xf0]  ;;  %v1307_v24 = vor.u32 %v1620_v13, %v1306_v12  ;;  %v1107_v35 = vor.u32 %v1570_v17, %v1106_v16 }
  0x15   :  { %694 = vmatpush.bf16.msra.mxu2 %v1259_v57  ;;  %v1298_v21 = vld [vmem:[%s2444_s1 + $0x180] sm:$0xf]  ;;  %v1618_v22 = vld [vmem:[%s2444_s1 + $0x184] sm:$0xf0]  ;;  %v1418_v25 = vld [vmem:[%s2444_s1 + $0x270] sm:$0xf]  ;;  %v1179_v28 = vor.u32 %v1588_v15, %v1178_v14  ;;  %v1235_v39 = vor.u32 %v1602_v20, %v1234_v19 }
  0x16   :  { %708 = vmatpush.bf16.msra.mxu3 %v1323_v58  ;;  %v1648_v26 = vld [vmem:[%s2444_s1 + $0x274] sm:$0xf0]  ;;  %v1583_v27 = vld [vmem:[%s2444_s1 + $0x74] sm:$0xf]  ;;  %v1164_v29 = vld [vmem:[%s2444_s1 + $0x78] sm:$0xf0]  ;;  %v1299_v40 = vor.u32 %v1618_v22, %v1298_v21 }
  0x17   :  { %680 = vmatpush.bf16.msra.mxu1 %v1195_v62  ;;  %v1170_v30 = vld [vmem:[%s2444_s1 + $0x80] sm:$0xf]  ;;  %v1586_v31 = vld [vmem:[%s2444_s1 + $0x84] sm:$0xf0]  ;;  %v1566_v33 = vld [vmem:[%s2445_s0 + $0x20] sm:$0xf0]  ;;  %v1419_v44 = vor.u32 %v1648_v26, %v1418_v25  ;;  %v1167_v45 = vor.u32 %v1583_v27, %v1164_v29 }
  0x18   :  { %667 = vmatpush.bf16.msra.mxu0 %v1123_v4  ;;  %v1086_v32 = vld [vmem:[%s2445_s0 + $0x8] sm:$0xf]  ;;  %v1482_v34 = vld [vmem:[%s2444_s1 + $0x2f0] sm:$0xf]  ;;  %v1664_v36 = vld [vmem:[%s2444_s1 + $0x2f4] sm:$0xf0]  ;;  %v1171_v49 = vor.u32 %v1586_v31, %v1170_v30 }
  0x19   :  { %695 = vmatpush.bf16.msra.mxu2 %v1251_v6  ;;  %v1490_v37 = vld [vmem:[%s2444_s1 + $0x300] sm:$0xf]  ;;  %v1666_v38 = vld [vmem:[%s2444_s1 + $0x304] sm:$0xf0]  ;;  %v1599_v41 = vld [vmem:[%s2444_s1 + $0xf4] sm:$0xf]  ;;  %v1976_v54 = vor.u32 %v1566_v33, %v1086_v32  ;;  %v1483_v55 = vor.u32 %v1664_v36, %v1482_v34 }
  0x1a   :  { %709 = vmatpush.bf16.msra.mxu3 %v1315_v7  ;;  %v1228_v42 = vld [vmem:[%s2444_s1 + $0xf8] sm:$0xf0]  ;;  %v1078_v43 = vld [vmem:[%s2445_s0] sm:$0xf]  ;;  %v1563_v47 = vld [vmem:[%s2445_s0 + $0xc] sm:$0xf]  ;;  %v1491_v50 = vor.u32 %v1666_v38, %v1490_v37 }
  0x1b   :  { %681 = vmatpush.bf16.msra.mxu1 %v1187_v11  ;;  %v1565_v46 = vld [vmem:[%s2445_s0 + $0x18] sm:$0xf0]  ;;  %v1088_v48 = vld [vmem:[%s2445_s0 + $0x24] sm:$0xf0]  ;;  %v1410_v51 = vld [vmem:[%s2444_s1 + $0x260] sm:$0xf]  ;;  %v1231_v59 = vor.u32 %v1599_v41, %v1228_v42 }
  0x1c   :  { %668 = vmatpush.bf16.msra.mxu0 %v1115_v18  ;;  %v1646_v52 = vld [vmem:[%s2444_s1 + $0x264] sm:$0xf0]  ;;  %v1581_v53 = vld [vmem:[%s2444_s1 + $0x64] sm:$0xf]  ;;  %v1156_v56 = vld [vmem:[%s2444_s1 + $0x68] sm:$0xf0]  ;;  %v1987_v60 = vor.u32 %v1565_v46, %v1078_v43  ;;  %v1995_v63 = vor.u32 %v1563_v47, %v1088_v48 }
  0x1d   :  { %696 = vmatpush.bf16.msra.mxu2 %v1243_v23  ;;  %v1562_v57 = vld [vmem:[%s2445_s0 + $0x4] sm:$0xf]  ;;  %v1080_v58 = vld [vmem:[%s2445_s0 + $0x1c] sm:$0xf0]  ;;  %v1662_v62 = vld [vmem:[%s2444_s1 + $0x2e4] sm:$0xf0]  ;;  %v1411_v0 = vor.u32 %v1646_v52, %v1410_v51  ;;  %v1159_v3 = vor.u32 %v1581_v53, %v1156_v56 }
  0x1e   :  { %710 = vmatpush.bf16.msra.mxu3 %v1307_v24  ;;  %v1474_v61 = vld [vmem:[%s2444_s1 + $0x2e0] sm:$0xf]  ;;  %v1597_v1 = vld [vmem:[%s2444_s1 + $0xe4] sm:$0xf]  ;;  %v1220_v2 = vld [vmem:[%s2444_s1 + $0xe8] sm:$0xf0]  ;;  %v2003_v4 = vor.u32 %v1562_v57, %v1080_v58 }
  0x1f   :  { %682 = vmatpush.bf16.msra.mxu1 %v1179_v28  ;;  %v1402_v5 = vld [vmem:[%s2444_s1 + $0x250] sm:$0xf]  ;;  %v1644_v6 = vld [vmem:[%s2444_s1 + $0x254] sm:$0xf0]  ;;  %v1475_v7 = vor.u32 %v1662_v62, %v1474_v61  ;;  %v1579_v8 = vld [vmem:[%s2444_s1 + $0x54] sm:$0xf]  ;;  %v1223_v10 = vor.u32 %v1597_v1, %v1220_v2 }
  0x20   :  { %669 = vmatpush.bf16.msra.mxu0 %v1107_v35  ;;  %v1148_v9 = vld [vmem:[%s2444_s1 + $0x58] sm:$0xf0]  ;;  %v1466_v11 = vld [vmem:[%s2444_s1 + $0x2d0] sm:$0xf]  ;;  %v1660_v12 = vld [vmem:[%s2444_s1 + $0x2d4] sm:$0xf0]  ;;  %v1403_v13 = vor.u32 %v1644_v6, %v1402_v5 }
  0x21   :  { %697 = vmatpush.bf16.msra.mxu2 %v1235_v39  ;;  %v1595_v14 = vld [vmem:[%s2444_s1 + $0xd4] sm:$0xf]  ;;  %v1212_v15 = vld [vmem:[%s2444_s1 + $0xd8] sm:$0xf0]  ;;  %v1151_v16 = vor.u32 %v1579_v8, %v1148_v9  ;;  %v1394_v17 = vld [vmem:[%s2444_s1 + $0x240] sm:$0xf]  ;;  %v1467_v19 = vor.u32 %v1660_v12, %v1466_v11 }
  0x22   :  { %711 = vmatpush.bf16.msra.mxu3 %v1299_v40  ;;  %v1642_v18 = vld [vmem:[%s2444_s1 + $0x244] sm:$0xf0]  ;;  %v1577_v20 = vld [vmem:[%s2444_s1 + $0x44] sm:$0xf]  ;;  %v1140_v21 = vld [vmem:[%s2444_s1 + $0x48] sm:$0xf0]  ;;  %v1215_v22 = vor.u32 %v1595_v14, %v1212_v15 }
  0x23   :  { %683 = vmatpush.bf16.msra.mxu1 %v1171_v49  ;;  %670 = vmatmul.bf16.vlgmr.msra.gmra.mxu0 %v1987_v60  ;;  %v1458_v23 = vld [vmem:[%s2444_s1 + $0x2c0] sm:$0xf]  ;;  %v1658_v24 = vld [vmem:[%s2444_s1 + $0x2c4] sm:$0xf0]  ;;  %v1395_v25 = vor.u32 %v1642_v18, %v1394_v17  ;;  %v1593_v26 = vld [vmem:[%s2444_s1 + $0xc4] sm:$0xf]  ;;  %v1143_v28 = vor.u32 %v1577_v20, %v1140_v21 }
  0x24   :  { %718 = vmatpush.bf16.msrb.mxu0 %v1419_v44  ;;  %698 = vmatmul.bf16.vlgmr.msra.gmra.mxu2 %v1976_v54  ;;  %v1204_v27 = vld [vmem:[%s2444_s1 + $0xc8] sm:$0xf0]  ;;  %v1386_v29 = vld [vmem:[%s2444_s1 + $0x230] sm:$0xf]  ;;  %v1640_v30 = vld [vmem:[%s2444_s1 + $0x234] sm:$0xf0]  ;;  %v1459_v31 = vor.u32 %v1658_v24, %v1458_v23 }
  0x25   :  { %753 = vmatpush.bf16.msrb.mxu2 %v1491_v50  ;;  %712 = vmatmul.bf16.vlgmr.msra.gmra.mxu3 %v1995_v63  ;;  %v1575_v32 = vld [vmem:[%s2444_s1 + $0x34] sm:$0xf]  ;;  %v1132_v33 = vld [vmem:[%s2444_s1 + $0x38] sm:$0xf0]  ;;  %v1450_v34 = vld [vmem:[%s2444_s1 + $0x2b0] sm:$0xf]  ;;  %v1207_v35 = vor.u32 %v1593_v26, %v1204_v27  ;;  %v1387_v39 = vor.u32 %v1640_v30, %v1386_v29 }
  0x26   :  { %760 = vmatpush.bf16.msrb.mxu3 %v1167_v45  ;;  %684 = vmatmul.bf16.vlgmr.msra.gmra.mxu1 %v2003_v4  ;;  %v1656_v36 = vld [vmem:[%s2444_s1 + $0x2b4] sm:$0xf0]  ;;  %v1568_v38 = vld [vmem:[%s2445_s0 + $0x30] sm:$0xf0]  ;;  %v1196_v41 = vld [vmem:[%s2444_s1 + $0xb8] sm:$0xf0]  ;;  %v1135_v42 = vor.u32 %v1575_v32, %v1132_v33 }
  0x27   :  { %732 = vmatpush.bf16.msrb.mxu1 %v1483_v55  ;;  %v1102_v37 = vld [vmem:[%s2445_s0 + $0x18] sm:$0xf]  ;;  %v1591_v40 = vld [vmem:[%s2444_s1 + $0xb4] sm:$0xf]  ;;  %v1378_v43 = vld [vmem:[%s2444_s1 + $0x220] sm:$0xf]  ;;  %v1451_v45 = vor.u32 %v1656_v36, %v1450_v34 }
  0x28   :  { %719 = vmatpush.bf16.msrb.mxu0 %v1411_v0  ;;  %v1638_v44 = vld [vmem:[%s2444_s1 + $0x224] sm:$0xf0]  ;;  %v1573_v46 = vld [vmem:[%s2444_s1 + $0x24] sm:$0xf]  ;;  %v1124_v47 = vld [vmem:[%s2444_s1 + $0x28] sm:$0xf0]  ;;  %v2099_v48 = vor.u32 %v1568_v38, %v1102_v37  ;;  %v1199_v49 = vor.u32 %v1591_v40, %v1196_v41 }
  0x29   :  { %774 = vmatpush.bf16.msra.mxu2 %v1231_v59  ;;  %v1442_v50 = vld [vmem:[%s2444_s1 + $0x2a0] sm:$0xf]  ;;  %v1654_v51 = vld [vmem:[%s2444_s1 + $0x2a4] sm:$0xf0]  ;;  %v1379_v52 = vor.u32 %v1638_v44, %v1378_v43  ;;  %v1589_v53 = vld [vmem:[%s2444_s1 + $0xa4] sm:$0xf]  ;;  %v1127_v56 = vor.u32 %v1573_v46, %v1124_v47 }
  0x2a   :  { %761 = vmatpush.bf16.msrb.mxu3 %v1159_v3  ;;  %v1188_v55 = vld [vmem:[%s2444_s1 + $0xa8] sm:$0xf0]  ;;  %v1370_v57 = vld [vmem:[%s2444_s1 + $0x210] sm:$0xf]  ;;  %v1636_v58 = vld [vmem:[%s2444_s1 + $0x214] sm:$0xf0]  ;;  %v1443_v61 = vor.u32 %v1654_v51, %v1442_v50 }
  0x2b   :  { %733 = vmatpush.bf16.msrb.mxu1 %v1475_v7  ;;  %v1571_v59 = vld [vmem:[%s2444_s1 + $0x14] sm:$0xf]  ;;  %v1116_v62 = vld [vmem:[%s2444_s1 + $0x18] sm:$0xf0]  ;;  %v1434_v0 = vld [vmem:[%s2444_s1 + $0x290] sm:$0xf]  ;;  %v1191_v2 = vor.u32 %v1589_v53, %v1188_v55  ;;  %v1371_v7 = vor.u32 %v1636_v58, %v1370_v57 }
  0x2c   :  { %720 = vmatpush.bf16.msrb.mxu0 %v1403_v13  ;;  %v1652_v1 = vld [vmem:[%s2444_s1 + $0x294] sm:$0xf0]  ;;  %v1587_v3 = vld [vmem:[%s2444_s1 + $0x94] sm:$0xf]  ;;  %v1180_v5 = vld [vmem:[%s2444_s1 + $0x98] sm:$0xf0]  ;;  %v1119_v11 = vor.u32 %v1571_v59, %v1116_v62 }
  0x2d   :  { %775 = vmatpush.bf16.msra.mxu2 %v1223_v10  ;;  %v1362_v6 = vld [vmem:[%s2444_s1 + $0x200] sm:$0xf]  ;;  %v1634_v8 = vld [vmem:[%s2444_s1 + $0x204] sm:$0xf0]  ;;  %v1569_v9 = vld [vmem:[%s2444_s1 + $0x4] sm:$0xf]  ;;  %v1435_v15 = vor.u32 %v1652_v1, %v1434_v0 }
  0x2e   :  { %762 = vmatpush.bf16.msrb.mxu3 %v1151_v16  ;;  %v1108_v10 = vld [vmem:[%s2444_s1 + $0x8] sm:$0xf0]  ;;  %v1615_v12 = vld [vmem:[%s2444_s1 + $0x174] sm:$0xf]  ;;  %v1292_v13 = vld [vmem:[%s2444_s1 + $0x178] sm:$0xf0]  ;;  %v1363_v23 = vor.u32 %v1634_v8, %v1362_v6 }
  0x2f   :  { %734 = vmatpush.bf16.msrb.mxu1 %v1467_v19  ;;  %v1647_v14 = vld [vmem:[%s2444_s1 + $0x274] sm:$0xf]  ;;  %v1420_v16 = vld [vmem:[%s2444_s1 + $0x278] sm:$0xf0]  ;;  %v1426_v17 = vld [vmem:[%s2444_s1 + $0x280] sm:$0xf]  ;;  %v1183_v19 = vor.u32 %v1587_v3, %v1180_v5  ;;  %v1111_v27 = vor.u32 %v1569_v9, %v1108_v10 }
  0x30   :  { %721 = vmatpush.bf16.msrb.mxu0 %v1395_v25  ;;  %v1650_v18 = vld [vmem:[%s2444_s1 + $0x284] sm:$0xf0]  ;;  %v1094_v20 = vld [vmem:[%s2445_s0 + $0x10] sm:$0xf]  ;;  %v1567_v21 = vld [vmem:[%s2445_s0 + $0x28] sm:$0xf0]  ;;  %v1423_v32 = vor.u32 %v1647_v14, %v1420_v16 }
  0x31   :  { %776 = vmatpush.bf16.msra.mxu2 %v1215_v22  ;;  %v1585_v22 = vld [vmem:[%s2444_s1 + $0x84] sm:$0xf]  ;;  %v1172_v24 = vld [vmem:[%s2444_s1 + $0x88] sm:$0xf0]  ;;  %v1631_v25 = vld [vmem:[%s2444_s1 + $0x1f4] sm:$0xf]  ;;  %v1427_v33 = vor.u32 %v1650_v18, %v1426_v17  ;;  %v2205_v37 = vor.u32 %v1567_v21, %v1094_v20 }
  0x32   :  { %763 = vmatpush.bf16.msrb.mxu3 %v1143_v28  ;;  %v1356_v26 = vld [vmem:[%s2444_s1 + $0x1f8] sm:$0xf0]  ;;  %v1295_v28 = vor.u32 %v1615_v12, %v1292_v13  ;;  %v1663_v29 = vld [vmem:[%s2444_s1 + $0x2f4] sm:$0xf]  ;;  %v1096_v34 = vld [vmem:[%s2445_s0 + $0x2c] sm:$0xf0]  ;;  %v1175_v38 = vor.u32 %v1585_v22, %v1172_v24 }
  0x33   :  { %735 = vmatpush.bf16.msrb.mxu1 %v1459_v31  ;;  %v1484_v30 = vld [vmem:[%s2444_s1 + $0x2f8] sm:$0xf0]  ;;  %v1564_v31 = vld [vmem:[%s2445_s0 + $0x14] sm:$0xf]  ;;  %v1284_v36 = vld [vmem:[%s2444_s1 + $0x168] sm:$0xf0]  ;;  %v1359_v41 = vor.u32 %v1631_v25, %v1356_v26 }
  0x34   :  { %722 = vmatpush.bf16.msrb.mxu0 %v1387_v39  ;;  %1496 = vmatmul.msk.bf16.vlgmr.msrb.gmra.mxu2 %vm658_vm0, %v2099_v48  ;;  %v1645_v39 = vld [vmem:[%s2444_s1 + $0x264] sm:$0xf]  ;;  %v1412_v40 = vld [vmem:[%s2444_s1 + $0x268] sm:$0xf0]  ;;  %v2216_v44 = vor.u32 %v1564_v31, %v1096_v34  ;;  %v1611_v51 = vld [vmem:[%s2444_s1 + $0x154] sm:$0xf] }
  0x35   :  { %777 = vmatpush.bf16.msra.mxu2 %v1207_v35  ;;  %v1613_v35 = vld [vmem:[%s2444_s1 + $0x164] sm:$0xf]  ;;  %v1348_v46 = vld [vmem:[%s2444_s1 + $0x1e8] sm:$0xf0]  ;;  %v1415_v50 = vor.u32 %v1645_v39, %v1412_v40  ;;  %v1643_v53 = vld [vmem:[%s2444_s1 + $0x254] sm:$0xf] }
  0x36   :  { %764 = vmatpush.bf16.msrb.mxu3 %v1135_v42  ;;  %v1487_v42 = vor.u32 %v1663_v29, %v1484_v30  ;;  %v1629_v43 = vld [vmem:[%s2444_s1 + $0x1e4] sm:$0xf]  ;;  %v1404_v55 = vld [vmem:[%s2444_s1 + $0x258] sm:$0xf0]  ;;  %v1627_v58 = vld [vmem:[%s2444_s1 + $0x1d4] sm:$0xf] }
  0x37   :  { %736 = vmatpush.bf16.msrb.mxu1 %v1451_v45  ;;  %v1287_v45 = vor.u32 %v1613_v35, %v1284_v36  ;;  %v1661_v47 = vld [vmem:[%s2444_s1 + $0x2e4] sm:$0xf]  ;;  %v1659_v62 = vld [vmem:[%s2444_s1 + $0x2d4] sm:$0xf]  ;;  %v1468_v0 = vld [vmem:[%s2444_s1 + $0x2d8] sm:$0xf0]  ;;  %v1407_v1 = vor.u32 %v1643_v53, %v1404_v55 }
  0x38   :  { %723 = vmatpush.bf16.msrb.mxu0 %v1379_v52  ;;  %v1276_v52 = vld [vmem:[%s2444_s1 + $0x158] sm:$0xf0]  ;;  %v1268_v3 = vld [vmem:[%s2444_s1 + $0x148] sm:$0xf0]  ;;  %v1641_v5 = vld [vmem:[%s2444_s1 + $0x244] sm:$0xf]  ;;  %v1471_v8 = vor.u32 %v1659_v62, %v1468_v0 }
  0x39   :  { %778 = vmatpush.bf16.msra.mxu2 %v1199_v49  ;;  %v1476_v49 = vld [vmem:[%s2444_s1 + $0x2e8] sm:$0xf0]  ;;  %v1279_v59 = vor.u32 %v1611_v51, %v1276_v52  ;;  %v1625_v9 = vld [vmem:[%s2444_s1 + $0x1c4] sm:$0xf]  ;;  %v1607_v13 = vld [vmem:[%s2444_s1 + $0x134] sm:$0xf] }
  0x3a   :  { %765 = vmatpush.bf16.msrb.mxu3 %v1127_v56  ;;  %v1351_v56 = vor.u32 %v1629_v43, %v1348_v46  ;;  %v1479_v57 = vor.u32 %v1661_v47, %v1476_v49  ;;  %v1396_v6 = vld [vmem:[%s2444_s1 + $0x248] sm:$0xf0]  ;;  %v1260_v14 = vld [vmem:[%s2444_s1 + $0x138] sm:$0xf0]  ;;  %v1655_v22 = vld [vmem:[%s2444_s1 + $0x2b4] sm:$0xf] }
  0x3b   :  { %737 = vmatpush.bf16.msrb.mxu1 %v1443_v61  ;;  %v1340_v61 = vld [vmem:[%s2444_s1 + $0x1d8] sm:$0xf0]  ;;  %v1332_v10 = vld [vmem:[%s2444_s1 + $0x1c8] sm:$0xf0]  ;;  %v1399_v12 = vor.u32 %v1641_v5, %v1396_v6  ;;  %v1263_v20 = vor.u32 %v1607_v13, %v1260_v14  ;;  %v1605_v25 = vld [vmem:[%s2444_s1 + $0x124] sm:$0xf] }
  0x3c   :  { %724 = vmatpush.bf16.msrb.mxu0 %v1371_v7  ;;  %v1343_v7 = vor.u32 %v1627_v58, %v1340_v61  ;;  %v1388_v16 = vld [vmem:[%s2444_s1 + $0x238] sm:$0xf0]  ;;  %v1335_v17 = vor.u32 %v1625_v9, %v1332_v10  ;;  %v1252_v26 = vld [vmem:[%s2444_s1 + $0x128] sm:$0xf0]  ;;  %v1621_v31 = vld [vmem:[%s2444_s1 + $0x1a4] sm:$0xf] }
  0x3d   :  { %779 = vmatpush.bf16.msra.mxu2 %v1191_v2  ;;  %v1609_v2 = vld [vmem:[%s2444_s1 + $0x144] sm:$0xf]  ;;  %v1324_v21 = vld [vmem:[%s2444_s1 + $0x1b8] sm:$0xf0]  ;;  %v1444_v35 = vld [vmem:[%s2444_s1 + $0x2a8] sm:$0xf0] }
  0x3e   :  { %766 = vmatpush.bf16.msrb.mxu3 %v1119_v11  ;;  %v1657_v11 = vld [vmem:[%s2444_s1 + $0x2c4] sm:$0xf]  ;;  %v1244_v39 = vld [vmem:[%s2444_s1 + $0x118] sm:$0xf0]  ;;  %v1635_v40 = vld [vmem:[%s2444_s1 + $0x214] sm:$0xf] }
  0x3f   :  { %738 = vmatpush.bf16.msrb.mxu1 %v1435_v15  ;;  %v1639_v15 = vld [vmem:[%s2444_s1 + $0x234] sm:$0xf]  ;;  %v1653_v34 = vld [vmem:[%s2444_s1 + $0x2a4] sm:$0xf]  ;;  %v1308_v47 = vld [vmem:[%s2444_s1 + $0x198] sm:$0xf0] }
  0x40   :  { %725 = vmatpush.bf16.msrb.mxu0 %v1363_v23  ;;  %v1452_v23 = vld [vmem:[%s2444_s1 + $0x2b8] sm:$0xf0]  ;;  %v1391_v24 = vor.u32 %v1639_v15, %v1388_v16  ;;  %v1447_v43 = vor.u32 %v1653_v34, %v1444_v35  ;;  %v1651_v49 = vld [vmem:[%s2444_s1 + $0x294] sm:$0xf]  ;;  %v1601_v52 = vld [vmem:[%s2444_s1 + $0x104] sm:$0xf] }
  0x41   :  { %780 = vmatpush.bf16.msra.mxu2 %v1183_v19  ;;  %v1623_v19 = vld [vmem:[%s2444_s1 + $0x1b4] sm:$0xf]  ;;  %v1455_v30 = vor.u32 %v1655_v22, %v1452_v23  ;;  %v1236_v53 = vld [vmem:[%s2444_s1 + $0x108] sm:$0xf0]  ;;  %v1633_v55 = vld [vmem:[%s2444_s1 + $0x204] sm:$0xf] }
  0x42   :  { %767 = vmatpush.bf16.msrb.mxu3 %v1111_v27  ;;  %v1637_v27 = vld [vmem:[%s2444_s1 + $0x224] sm:$0xf]  ;;  %v1327_v29 = vor.u32 %v1623_v19, %v1324_v21  ;;  %v1492_v58 = vld [vmem:[%s2444_s1 + $0x308] sm:$0xf0]  ;;  %v1239_v62 = vor.u32 %v1601_v52, %v1236_v53  ;;  %v1674_v9 = vld [vmem:[%s2447_s3 + $0x38] sm:$0xff] }
  0x43   :  { %739 = vmatpush.bf16.msrb.mxu1 %v1427_v33  ;;  %726 = vmatmul.bf16.vlgmr.msrb.gmra.mxu0 %v2205_v37  ;;  %v1316_v33 = vld [vmem:[%s2444_s1 + $0x1a8] sm:$0xf0]  ;;  %v1617_v0 = vld [vmem:[%s2444_s1 + $0x184] sm:$0xf]  ;;  %v127_v10 = vld [vmem:[%s2448_s2] sm:$0x3] }
  0x44   :  { %788 = vmatpush.bf16.msra.mxu0 %v1295_v28  ;;  %v1380_v28 = vld [vmem:[%s2444_s1 + $0x228] sm:$0xf0]  ;;  %v129_v14 = vperm.slane %v127_v10, 0  ;;  %v1682_v22 = vld [vmem:[%s2447_s3 + $0x78] sm:$0xff] }
  0x45   :  { %781 = vmatpush.bf16.msra.mxu2 %v1175_v38  ;;  %768 = vmatmul.bf16.vlgmr.msrb.gmra.mxu3 %v1987_v60  ;;  %v1460_v60 = vld [vmem:[%s2444_s1 + $0x2c8] sm:$0xf0]  ;;  %v1383_v36 = vor.u32 %v1637_v27, %v1380_v28  ;;  %v1603_v38 = vld [vmem:[%s2444_s1 + $0x114] sm:$0xf] }
  0x46   :  { %816 = vmatpush.bf16.msra.mxu3 %v1423_v32  ;;  %740 = vmatmul.bf16.vlgmr.msrb.gmra.mxu1 %v2216_v44  ;;  %v1463_v18 = vor.u32 %v1657_v11, %v1460_v60  ;;  %v1255_v32 = vor.u32 %v1605_v25, %v1252_v26  ;;  %v1247_v46 = vor.u32 %v1603_v38, %v1244_v39  ;;  %v1428_v5 = vld [vmem:[%s2444_s1 + $0x288] sm:$0xf0]  ;;  %v1681_v27 = vld [vmem:[%s2447_s3 + $0x70] sm:$0xff]  ;;  %v1679_v38 = vld [vmem:[%s2447_s3 + $0x60] sm:$0xff] }
  0x47   :  { %802 = vmatpush.bf16.msra.mxu1 %v1359_v41  ;;  %v1372_v41 = vld [vmem:[%s2444_s1 + $0x218] sm:$0xf0]  ;;  %v1676_v53 = vld [vmem:[%s2447_s3 + $0x48] sm:$0xff] }
  0x48   :  { %789 = vmatpush.bf16.msra.mxu0 %v1287_v45  ;;  %782 = vmatmul.bf16.vlgmr.msra.gmra.mxu2 %v2003_v4  ;;  %v1271_v4 = vor.u32 %v1609_v2, %v1268_v3  ;;  %v1619_v45 = vld [vmem:[%s2444_s1 + $0x194] sm:$0xf]  ;;  %v1375_v51 = vor.u32 %v1635_v40, %v1372_v41  ;;  %v1649_v3 = vld [vmem:[%s2444_s1 + $0x284] sm:$0xf] }
  0x49   :  { %830 = vmatpush.bf16.msrb.mxu2 %v1487_v42  ;;  %v1319_v42 = vor.u32 %v1621_v31, %v1316_v33  ;;  %v1680_v33 = vld [vmem:[%s2447_s3 + $0x68] sm:$0xff] }
  0x4a   :  { %817 = vmatpush.bf16.msra.mxu3 %v1415_v50  ;;  %v1436_v50 = vld [vmem:[%s2444_s1 + $0x298] sm:$0xf0] }
  0x4b   :  { %803 = vmatpush.bf16.msra.mxu1 %v1351_v56  ;;  %v1364_v56 = vld [vmem:[%s2444_s1 + $0x208] sm:$0xf0]  ;;  %v1439_v61 = vor.u32 %v1651_v49, %v1436_v50  ;;  %v1677_v50 = vld [vmem:[%s2447_s3 + $0x50] sm:$0xff] }
  0x4c   :  { %790 = vmatpush.bf16.msra.mxu0 %v1279_v59  ;;  %v1311_v59 = vor.u32 %v1619_v45, %v1308_v47  ;;  %v1367_v2 = vor.u32 %v1633_v55, %v1364_v56  ;;  %v1678_v45 = vld [vmem:[%s2447_s3 + $0x58] sm:$0xff]  ;;  %v1675_v56 = vld [vmem:[%s2447_s3 + $0x40] sm:$0xff] }
  0x4d   :  { %831 = vmatpush.bf16.msrb.mxu2 %v1479_v57  ;;  %v1665_v57 = vld [vmem:[%s2444_s1 + $0x304] sm:$0xf] }
  0x4e   :  { %818 = vmatpush.bf16.msra.mxu3 %v1407_v1  ;;  %v1300_v1 = vld [vmem:[%s2444_s1 + $0x188] sm:$0xf0]  ;;  %v1495_v6 = vor.u32 %v1665_v57, %v1492_v58  ;;  %v130_v57 = vperm.slane %v127_v10, 1 }
  0x4f   :  { %804 = vmatpush.bf16.msra.mxu1 %v1343_v7  ;;  %v1303_v7 = vor.u32 %v1617_v0, %v1300_v1 }
  0x50   :  { %791 = vmatpush.bf16.msra.mxu0 %v1271_v4  ;;  %v1673_v4 = vld [vmem:[%s2447_s3 + $0x30] sm:$0xff] }
  0x51   :  { %832 = vmatpush.bf16.msrb.mxu2 %v1471_v8  ;;  %v1431_v8 = vor.u32 %v1649_v3, %v1428_v5 }
  0x52   :  { %819 = vmatpush.bf16.msra.mxu3 %v1399_v12  ;;  %v1667_v12 = vld [vmem:[%s2447_s3] sm:$0xff] }
  0x53   :  { %805 = vmatpush.bf16.msra.mxu1 %v1335_v17 }
  0x54   :  { %792 = vmatpush.bf16.msra.mxu0 %v1263_v20 }
  0x55   :  { %833 = vmatpush.bf16.msrb.mxu2 %v1463_v18 }
  0x56   :  { %820 = vmatpush.bf16.msra.mxu3 %v1391_v24 }
  0x57   :  { %806 = vmatpush.bf16.msra.mxu1 %v1327_v29 }
  0x58   :  { %793 = vmatpush.bf16.msra.mxu0 %v1255_v32 }
  0x59   :  { %834 = vmatpush.bf16.msrb.mxu2 %v1455_v30 }
  0x5a   :  { %821 = vmatpush.bf16.msra.mxu3 %v1383_v36 }
  0x5b   :  { %807 = vmatpush.bf16.msra.mxu1 %v1319_v42 }
  0x5c   :  { %794 = vmatpush.bf16.msra.mxu0 %v1247_v46 }
  0x5d   :  { %835 = vmatpush.bf16.msrb.mxu2 %v1447_v43 }
  0x5e   :  { %822 = vmatpush.bf16.msra.mxu3 %v1375_v51 }
  0x5f   :  { %808 = vmatpush.bf16.msra.mxu1 %v1311_v59 }
  0x60   :  { %795 = vmatpush.bf16.msra.mxu0 %v1239_v62 }
  0x61   :  { %836 = vmatpush.bf16.msrb.mxu2 %v1439_v61 }
  0x62   :  { %823 = vmatpush.bf16.msra.mxu3 %v1367_v2 }
  0x63   :  { %809 = vmatpush.bf16.msra.mxu1 %v1303_v7  ;;  %796 = vmatmul.bf16.vlgmr.msra.gmra.mxu0 %v1976_v54  ;;  %v1672_v54 = vld [vmem:[%s2447_s3 + $0x28] sm:$0xff] }
  0x64   :  { %851 = vmatpush.bf16.msrb.mxu0 %v1495_v6 }
  0x65   :  { %824 = vmatmul.bf16.vlgmr.msra.gmra.mxu3 %v2205_v37  ;;  %837 = vmatpush.bf16.msrb.mxu2 %v1431_v8  ;;  %v1669_v37 = vld [vmem:[%s2447_s3 + $0x10] sm:$0xff] }
  0x66   :  { %810 = vmatmul.bf16.vlgmr.msra.gmra.mxu1 %v1995_v63  ;;  %v1671_v63 = vld [vmem:[%s2447_s3 + $0x20] sm:$0xff]  ;;  %1010 = vmatpush.bf16.msrb.mxu3 %v1682_v22 }
  0x67   :  { %996 = vmatpush.bf16.msrb.mxu1 %v1674_v9 }
  0x68   :  { %838 = vmatmul.bf16.vlgmr.msrb.gmra.mxu2 %v2216_v44  ;;  %v1668_v44 = vld [vmem:[%s2447_s3 + $0x8] sm:$0xff] }
  0x6a   :  { %1011 = vmatpush.bf16.msrb.mxu3 %v1681_v27 }
  0x6b   :  { %997 = vmatpush.bf16.msrb.mxu1 %v1673_v4 }
  0x6e   :  { %1012 = vmatpush.bf16.msrb.mxu3 %v1680_v33 }
  0x6f   :  { %998 = vmatpush.bf16.msrb.mxu1 %v1672_v54 }
  0x72   :  { %1013 = vmatpush.bf16.msrb.mxu3 %v1679_v38 }
  0x73   :  { %1497 = vmatmul.msk.bf16.vlgmr.msrb.gmra.mxu0 %vm658_vm0, %v2099_v48  ;;  %999 = vmatpush.bf16.msrb.mxu1 %v1671_v63  ;;  %v1670_v48 = vld [vmem:[%s2447_s3 + $0x18] sm:$0xff] }
  0x76   :  { %1014 = vmatpush.bf16.msrb.mxu3 %v1678_v45 }
  0x77   :  { %1000 = vmatpush.bf16.msrb.mxu1 %v1670_v48 }
  0x7a   :  { %1015 = vmatpush.bf16.msrb.mxu3 %v1677_v50 }
  0x7b   :  { %1001 = vmatpush.bf16.msrb.mxu1 %v1669_v37 }
  0x7e   :  { %1016 = vmatpush.bf16.msrb.mxu3 %v1676_v53 }
  0x7f   :  { %1002 = vmatpush.bf16.msrb.mxu1 %v1668_v44 }
  0x82   :  { %1017 = vmatpush.bf16.msrb.mxu3 %v1675_v56 }
  0x83   :  { %1003 = vmatpush.bf16.msrb.mxu1 %v1667_v12 }
  0xa0   :  { %v671_v11 = vpop.f32.mrf.mxu0 }
  0xa1   :  { %v672_v15 = vadd.f32 %v671_v11, %v129_v14 }
  0xa3   :  { %v685_v13 = vpop.f32.mrf.mxu1 }
  0xa4   :  { %v686_v18 = vadd.f32 %v685_v13, %v672_v15 }
  0xa7   :  { %v699_v60 = vpop.f32.mrf.mxu2 }
  0xa8   :  { %v673_v16 = vpop.f32.mrf.mxu0  ;;  %v713_v19 = vpop.f32.mrf.mxu3  ;;  %v700_v23 = vadd.f32 %v699_v60, %v686_v18 }
  0xa9   :  { %v674_v21 = vadd.f32 %v673_v16, %v129_v14 }
  0xaa   :  { %v714_v28 = vadd.f32 %v713_v19, %v700_v23 }
  0xab   :  { %v687_v20 = vpop.f32.mrf.mxu1 }
  0xac   :  { %v688_v24 = vadd.f32 %v687_v20, %v674_v21  ;;  %v1688_v20 = vld [vmem:[%s2446_s4] ss:$0 sm:$0xff] }
  0xaf   :  { %v701_v17 = vpop.f32.mrf.mxu2 }
  0xb0   :  { %v702_v30 = vadd.f32 %v701_v17, %v688_v24  ;;  %v715_v32 = vpop.f32.mrf.mxu3 }
  0xb2   :  { %v716_v34 = vadd.f32 %v715_v32, %v702_v30 }
  0xb7   :  { %v755_v26 = vpop.f32.mrf.mxu2 }
  0xbf   :  { %v757_v41 = vpop.f32.mrf.mxu2 }
  0xc0   :  { %v727_v25 = vpop.f32.mrf.mxu0 }
  0xc1   :  { %v728_v31 = vadd.f32 %v727_v25, %v714_v28 }
  0xc3   :  { %v741_v29 = vpop.f32.mrf.mxu1 }
  0xc4   :  { %v742_v35 = vadd.f32 %v741_v29, %v728_v31 }
  0xc6   :  { %v756_v42 = vadd.f32 %v755_v26, %v742_v35 }
  0xc8   :  { %v729_v36 = vpop.f32.mrf.mxu0  ;;  %v858_v47 = vmax.f32 %v756_v42, 0.0  ;;  %v769_v52 = vpop.f32.mrf.mxu3 }
  0xc9   :  { %v730_v39 = vadd.f32 %v729_v36, %v716_v34  ;;  %v770_v62 = vadd.f32 %v769_v52, %v130_v57 }
  0xcb   :  { %v743_v40 = vpop.f32.mrf.mxu1  ;;  %v783_v55 = vpop.f32.mrf.mxu2 }
  0xcc   :  { %v744_v43 = vadd.f32 %v743_v40, %v730_v39  ;;  %v784_v1 = vadd.f32 %v783_v55, %v770_v62 }
  0xce   :  { %v758_v46 = vadd.f32 %v757_v41, %v744_v43 }
  0xd0   :  { %v860_v49 = vmax.f32 %v758_v46, 0.0  ;;  %v771_v58 = vpop.f32.mrf.mxu3 }
  0xd1   :  { %v772_v2 = vadd.f32 %v771_v58, %v130_v57 }
  0xd2   :  { %v862_v51 = vpack.c.bf16 %v860_v49, %v858_v47 }
  0xd3   :  { %v785_v61 = vpop.f32.mrf.mxu2 }
  0xd4   :  { %1004 = vmatmul.bf16.vlgmr.msrb.gmra.mxu1 %v862_v51  ;;  %v786_v7 = vadd.f32 %v785_v61, %v772_v2 }
  0xe0   :  { %v797_v59 = vpop.f32.mrf.mxu0 }
  0xe1   :  { %v798_v8 = vadd.f32 %v797_v59, %v784_v1 }
  0xe3   :  { %v811_v0 = vpop.f32.mrf.mxu1 }
  0xe4   :  { %v812_v54 = vadd.f32 %v811_v0, %v798_v8 }
  0xe8   :  { %v825_v3 = vpop.f32.mrf.mxu3  ;;  %v799_v5 = vpop.f32.mrf.mxu0 }
  0xe9   :  { %v800_v9 = vadd.f32 %v799_v5, %v786_v7  ;;  %v826_v37 = vadd.f32 %v825_v3, %v812_v54 }
  0xeb   :  { %v839_v6 = vpop.f32.mrf.mxu2  ;;  %v813_v4 = vpop.f32.mrf.mxu1 }
  0xec   :  { %v814_v44 = vadd.f32 %v813_v4, %v800_v9  ;;  %v840_v60 = vadd.f32 %v839_v6, %v826_v37 }
  0xf0   :  { %v827_v63 = vpop.f32.mrf.mxu3  ;;  %v853_v48 = vpop.f32.mrf.mxu0 }
  0xf1   :  { %v828_v10 = vadd.f32 %v827_v63, %v814_v44  ;;  %v854_v12 = vadd.f32 %v853_v48, %v840_v60 }
  0xf3   :  { %v841_v11 = vpop.f32.mrf.mxu2  ;;  %v859_v16 = vmax.f32 %v854_v12, 0.0 }
  0xf4   :  { %v842_v13 = vadd.f32 %v841_v11, %v828_v10 }
  0xf8   :  { %v855_v14 = vpop.f32.mrf.mxu0 }
  0xf9   :  { %v856_v15 = vadd.f32 %v855_v14, %v842_v13 }
  0xfb   :  { %v861_v17 = vmax.f32 %v856_v15, 0.0 }
  0xfd   :  { %v863_v18 = vpack.c.bf16 %v861_v17, %v859_v16 }
  0xff   :  { %1018 = vmatmul.bf16.vlgmr.msrb.gmra.mxu3 %v863_v18 }
 0x151   :  { %v1005_v19 = vpop.f32.mrf.mxu1 }
 0x152   :  { %v1006_v21 = vadd.f32 %v1688_v20, %v1005_v19 }
 0x159   :  { %v1007_v24 = vpop.f32.mrf.mxu1 }
 0x15a   :  { %v1008_v25 = vadd.f32 %v1688_v20, %v1007_v24 }
 0x182   :  { %v1019_v22 = vpop.f32.mrf.mxu3 }
 0x183   :  { %v1020_v23 = vadd.f32 %v1019_v22, %v1006_v21 }
 0x185   :  { %1024 = vmax.xlane.f32.xlu0 %v1020_v23 }
 0x18a   :  { %v1021_v26 = vpop.f32.mrf.mxu3 }
 0x18b   :  { %v1022_v27 = vadd.f32 %v1021_v26, %v1008_v25 }
 0x18d   :  { %1026 = vmax.xlane.f32.xlu0 %v1022_v27 }
 0x1f8   :  { %v1025_v28 = vpop.xlane.xlu0 %1024 }
 0x1f9   :  { %v1028_v29 = vsub.f32 %v1020_v23, %v1025_v28 }
 0x1fb   :  { %v1030_v30 = vmul.f32 1.442695, %v1028_v29 }
 0x1fd   :  { %1689 = vpow2.f32 %v1030_v30 }
 0x200   :  { %v1027_v31 = vpop.xlane.xlu0 %1026 }
 0x201   :  { %v1029_v32 = vsub.f32 %v1022_v27, %v1027_v31 }
 0x203   :  { %v1690_v33 = vpop.eup %1689  ;;  %v1032_v34 = vmul.f32 1.442695, %v1029_v32 }
 0x204   :  { %1034 = vadd.xlane.f32.xlu1 %v1690_v33 }
 0x205   :  { %1691 = vpow2.f32 %v1032_v34 }
 0x20b   :  { %v1692_v35 = vpop.eup %1691 }
 0x20c   :  { %1036 = vadd.xlane.f32.xlu1 %v1692_v35 }
 0x277   :  { %v1035_v36 = vpop.xlane.xlu1 %1034 }
 0x278   :  { %1693 = vrcp.f32 %v1035_v36  ;;  %v1049_v47 = vand.u32 2147483648, %v1035_v36  ;;  %vm1043_vm2 = vweird.f32 %v1035_v36  ;;  %v1047_v49 = vand.u32 2147483647, %v1035_v36 }
 0x27a   :  { %v1050_v56 = vor.u32 1.1754944e-38, %v1049_v47  ;;  %vm1048_vm5 = vcmp.eq.f32.partialorder %v1047_v49, 8.507059e+37 }
 0x27e   :  { %v1694_v38 = vpop.eup %1693 }
 0x27f   :  { %v1039_v39 = vmul.f32 %v1694_v38, %v1035_v36  ;;  %v1037_v40 = vpop.xlane.xlu1 %1036  ;;  %vm1044_vm1 = vweird.f32 %v1694_v38 }
 0x280   :  { %1695 = vrcp.f32 %v1037_v40  ;;  %vm1045_vm3 = vmor %vm1043_vm2, %vm1044_vm1  ;;  %v1064_v51 = vand.u32 2147483648, %v1037_v40  ;;  %v1062_v55 = vand.u32 2147483647, %v1037_v40  ;;  %vm1058_vm6 = vweird.f32 %v1037_v40 }
 0x281   :  { %v1040_v41 = vsub.f32 1.0, %v1039_v39 }
 0x282   :  { %v1065_v59 = vor.u32 1.1754944e-38, %v1064_v51  ;;  %vm1063_vm8 = vcmp.eq.f32.partialorder %v1062_v55, 8.507059e+37 }
 0x283   :  { %v1041_v42 = vmul.f32 %v1694_v38, %v1040_v41 }
 0x285   :  { %v1042_v45 = vadd.f32 %v1694_v38, %v1041_v42 }
 0x286   :  { %v1696_v43 = vpop.eup %1695 }
 0x287   :  { %v1054_v46 = vmul.f32 %v1696_v43, %v1037_v40  ;;  %v1046_v52 = vsel %vm1045_vm3, %v1694_v38, %v1042_v45  ;;  %vm1059_vm4 = vweird.f32 %v1696_v43 }
 0x288   :  { %v1051_v58 = vsel %vm1048_vm5, %v1050_v56, %v1046_v52  ;;  %vm1060_vm7 = vmor %vm1058_vm6, %vm1059_vm4 }
 0x289   :  { %v1055_v50 = vsub.f32 1.0, %v1054_v46  ;;  %v1052_v0 = vmul.f32 %v1690_v33, %v1051_v58 }
 0x28b   :  { %v1056_v53 = vmul.f32 %v1696_v43, %v1055_v50 }
 0x28d   :  { %v1057_v57 = vadd.f32 %v1696_v43, %v1056_v53 }
 0x28f   :  { %v1061_v61 = vsel %vm1060_vm7, %v1696_v43, %v1057_v57 }
 0x290   :  { %v1066_v62 = vsel %vm1063_vm8, %v1065_v59, %v1061_v61 }
 0x291   :  { %v1067_v1 = vmul.f32 %v1692_v35, %v1066_v62 }
 0x293   :  { %v1686_v2 = vpack.c.bf16 %v1067_v1, %v1052_v0 }
 0x295   :  { %1687 = vst [vmem:[%s2449_s5] sm:$0xff] %v1686_v2  }

</bundles_post_ra>
